<compile_context>
chip_gen: v5e
topology: v5e:2x2
jax: 0.10.0
libtpu: 0.0.40
codegen_flags: <defaults>
</compile_context>

<pallas_src>
import functools
import math

import jax
import jax.numpy as jnp
from jax import lax
from jax.experimental import pallas as pl
from jax.experimental.pallas import tpu as pltpu


def _attention_slab_kernel(q_ref, k_ref, v_ref, energy_ref, out_ref, *, scale):
    """Fused attention over one batch block, as two full-shape MXU matmuls.

    q_ref: (Bb, E)   k_ref / v_ref: (Bb, T, E)
    energy_ref: (Bb, Bb*T) lane-dense block-diagonal softmax slab
    out_ref: (Bb, E)
    """
    Bb, T, E = k_ref.shape
    L = Bb * T

    # Fold 1/sqrt(d) into q: scales one small (Bb, E) tile instead of the
    # (Bb, L) energy slab.
    q = q_ref[...] * scale                                      # (Bb, E)

    # Collapse (Bb, T, E) -> (L, E); E stays the lane dim, so this is
    # layout-preserving (no data movement).
    k2 = k_ref[...].reshape(L, E)

    # ONE full-shape MXU matmul: (Bb, E) . (L, E)^T -> (Bb, L).  Kept f32 so
    # the returned softmax weights stay bit-close to torch.softmax.
    s = lax.dot_general(q, k2, (((1,), (1,)), ((), ())),
                        preferred_element_type=jnp.float32)     # (Bb, L)

    # Block-diagonal band mask: local batch row b owns lanes [b*T, (b+1)*T).
    row = lax.broadcasted_iota(jnp.int32, (Bb, L), 0)
    col = lax.broadcasted_iota(jnp.int32, (Bb, L), 1)
    lo = row * T
    in_band = (col >= lo) & (col < lo + T)

    # Numerically-stable softmax over the slab; off-band logits pushed to
    # -1e30 so exp() flushes them to exactly 0 -> the L-lane softmax equals
    # the per-batch T-lane softmax.
    s = jnp.where(in_band, s, jnp.float32(-1e30))
    m = jnp.max(s, axis=-1, keepdims=True)
    p = jnp.exp(s - m)
    denom = jnp.sum(p, axis=-1, keepdims=True)
    r = pl.reciprocal(denom, approx=True)        # EUP slot
    r = r * (2.0 - denom * r)                    # one Newton step -> ~f32 exact
    w = p * r                                    # (Bb, L), exact zeros off-band

    # Lane-dense store (L is a multiple of 128 -> unmasked vst); the wrapper
    # extracts the per-batch diagonal band.
    energy_ref[...] = w.astype(energy_ref.dtype)

    # Second full-shape MXU matmul: (Bb, L) . (L, E) -> (Bb, E); off-band zeros
    # contribute nothing.  bf16 operands, f32 accumulation.
    v2 = v_ref[...].reshape(L, E)
    out = jnp.dot(w.astype(jnp.bfloat16), v2.astype(jnp.bfloat16),
                  preferred_element_type=jnp.float32)
    out_ref[...] = out.astype(out_ref.dtype)


def _attention_vpu_kernel(q_ref, k_ref, v_ref, energy_ref, out_ref, *, scale):
    """Fallback (VPU mul + reduce) for shapes where the lane-dense slab
    restructure does not apply (block_b*T not a multiple of 128, etc.)."""
    q = (q_ref[...] * scale).astype(jnp.float32)                # (Bb, E)
    k = k_ref[...].astype(jnp.float32)                          # (Bb, T, E)
    s = jnp.sum(q[:, None, :] * k, axis=-1)                     # (Bb, T)
    s = s - jnp.max(s, axis=-1, keepdims=True)
    p = jnp.exp(s)
    denom = jnp.sum(p, axis=-1, keepdims=True)
    r = pl.reciprocal(denom, approx=True)
    r = r * (2.0 - denom * r)                                   # Newton refine
    w = p * r
    energy_ref[...] = w.astype(energy_ref.dtype)
    out = jnp.sum(w[:, :, None] * v_ref[...].astype(jnp.float32), axis=1)
    out_ref[...] = out.astype(out_ref.dtype)


_VMEM_BUDGET_BYTES = 12 * 1024 * 1024   # stay well inside default scoped VMEM


def _block_bytes(block_b, T, E, in_itemsize):
    L = block_b * T
    kv = 2 * block_b * T * E * in_itemsize       # k + v input blocks
    q = block_b * E * in_itemsize
    outs = block_b * (L + E) * 4                 # f32 outputs
    return 2 * (kv + q + outs)                   # x2: double buffering


def _pick_block_b(B, T, E, in_itemsize):
    """Largest batch block that keeps the energy slab lane-dense, fits VMEM,
    and (when possible) leaves >= 2 grid steps for v7x's two TensorCores."""
    cands = [b for b in range(8, B + 1, 8)
             if B % b == 0 and (b * T) % 128 == 0
             and _block_bytes(b, T, E, in_itemsize) <= _VMEM_BUDGET_BYTES]
    if not cands:
        return None
    multi = [b for b in cands if B // b >= 2]
    return max(multi) if multi else max(cands)


def attention_forward(query, keys, values, *, batch_first=True, query_dim=None):
    """Pallas equivalent of Attention.forward; returns (energy (B,1,T), out (B,E))."""
    if not batch_first:
        # torch: keys/values arrive (T, B, E); the module's transposes land them
        # in (B, T, E).  For batch_first=True the moveaxis+transpose cancel.
        keys = jnp.moveaxis(keys, 0, 1)
        values = jnp.moveaxis(values, 0, 1)

    B, E = query.shape
    T = keys.shape[1]
    if query_dim is None:
        query_dim = E
    scale = 1.0 / math.sqrt(query_dim)

    # TODO(synk): add flash-style T tiling (grid axis over T with online
    # softmax) for sequence lengths whose k/v blocks exceed the VMEM budget.
    block_b = _pick_block_b(B, T, E, jnp.dtype(keys.dtype).itemsize)

    if block_b is not None:
        L = block_b * T
        energy_slab, out = pl.pallas_call(
            functools.partial(_attention_slab_kernel, scale=scale),
            grid=(B // block_b,),
            in_specs=[
                pl.BlockSpec((block_b, E), lambda i: (i, 0)),
                pl.BlockSpec((block_b, T, E), lambda i: (i, 0, 0)),
                pl.BlockSpec((block_b, T, E), lambda i: (i, 0, 0)),
            ],
            out_specs=(
                pl.BlockSpec((block_b, L), lambda i: (i, 0)),
                pl.BlockSpec((block_b, E), lambda i: (i, 0)),
            ),
            out_shape=(
                jax.ShapeDtypeStruct((B, L), jnp.float32),
                jax.ShapeDtypeStruct((B, E), jnp.float32),
            ),
            compiler_params=pltpu.CompilerParams(
                dimension_semantics=("parallel",)),
        )(query, keys, values)
        # Slab is block-diagonal with exact zeros off-band: summing the
        # reshaped (B, block_b, T) slab over axis=1 extracts each batch row's
        # T softmax weights.  Wrapper-side layout plumbing only.
        energy = energy_slab.reshape(B, block_b, T).sum(axis=1)
    else:
        block_b = 8 if (B >= 8 and B % 8 == 0) else B
        energy, out = pl.pallas_call(
            functools.partial(_attention_vpu_kernel, scale=scale),
            grid=(B // block_b,),
            in_specs=[
                pl.BlockSpec((block_b, E), lambda i: (i, 0)),
                pl.BlockSpec((block_b, T, E), lambda i: (i, 0, 0)),
                pl.BlockSpec((block_b, T, E), lambda i: (i, 0, 0)),
            ],
            out_specs=(
                pl.BlockSpec((block_b, T), lambda i: (i, 0)),
                pl.BlockSpec((block_b, E), lambda i: (i, 0)),
            ),
            out_shape=(
                jax.ShapeDtypeStruct((B, T), jnp.float32),
                jax.ShapeDtypeStruct((B, E), jnp.float32),
            ),
            compiler_params=pltpu.CompilerParams(
                dimension_semantics=("parallel",)),
        )(query, keys, values)

    return energy[:, None, :], out


def attention_reference(query, keys, values, *, batch_first=True, query_dim=None):
    """Pure-JAX reference mirroring the PyTorch module, for a sanity check."""
    if not batch_first:
        keys = jnp.moveaxis(keys, 0, 1)
        values = jnp.moveaxis(values, 0, 1)
    if query_dim is None:
        query_dim = query.shape[-1]
    scale = 1.0 / math.sqrt(query_dim)
    energy = jnp.einsum('be,bte->bt', query, keys) * scale
    w = jax.nn.softmax(energy, axis=-1)
    out = jnp.einsum('bt,bte->be', w, values)
    return w[:, None, :], out


if __name__ == "__main__":
    key = jax.random.PRNGKey(0)
    kq, kk, kv = jax.random.split(key, 3)

    B, T, E = 16, 16, 128          # batch, sequence length, query/key/value dim
    query = jax.random.normal(kq, (B, E), jnp.float32)
    keys = jax.random.normal(kk, (B, T, E), jnp.float32)
    values = jax.random.normal(kv, (B, T, E), jnp.float32)

    energy, combo = attention_forward(query, keys, values, batch_first=True)
    energy, combo = jax.block_until_ready((energy, combo))

    assert energy.shape == (B, 1, T) and energy.dtype == jnp.float32
    assert combo.shape == (B, E) and combo.dtype == jnp.float32

    ref_energy, ref_combo = attention_reference(query, keys, values,
                                                batch_first=True)
    assert jnp.allclose(energy, ref_energy, rtol=1e-2, atol=1e-2)
    assert jnp.allclose(combo, ref_combo, rtol=1e-2, atol=1e-2)

    print("KERNEL_OK")
</pallas_src>

<mosaic_0001>
module attributes {stable_mosaic.version = 11 : i64} {
  func.func @_attention_slab_kernel(%arg0: i32, %arg1: memref<8x128xf32, #tpu.memory_space<vmem>>, %arg2: memref<8x16x128xf32, #tpu.memory_space<vmem>>, %arg3: memref<8x16x128xf32, #tpu.memory_space<vmem>>, %arg4: memref<8x128xf32, #tpu.memory_space<vmem>>, %arg5: memref<8x128xf32, #tpu.memory_space<vmem>>) attributes {dimension_semantics = [#tpu.dimension_semantics<parallel>], iteration_bounds = array<i64: 2>, scalar_prefetch = 0 : i64, scratch_operands = 0 : i64, tpu.core_type = #tpu.core_type<tc>, window_params = [{transform_indices = @transform_0, window_bounds = array<i64: 8, 128>}, {transform_indices = @transform_1, window_bounds = array<i64: 8, 16, 128>}, {transform_indices = @transform_2, window_bounds = array<i64: 8, 16, 128>}, {transform_indices = @transform_3, window_bounds = array<i64: 8, 128>}, {transform_indices = @transform_4, window_bounds = array<i64: 8, 128>}]} {
    %c0 = arith.constant 0 : index
    %c0_0 = arith.constant 0 : index
    %0 = vector.load %arg1[%c0, %c0_0] : memref<8x128xf32, #tpu.memory_space<vmem>>, vector<8x128xf32>
    %cst = arith.constant 0.0883883461 : f32
    %1 = vector.broadcast %cst : f32 to vector<8x128xf32>
    %2 = arith.mulf %0, %1 : vector<8x128xf32>
    %c0_1 = arith.constant 0 : index
    %c0_2 = arith.constant 0 : index
    %c0_3 = arith.constant 0 : index
    %3 = vector.load %arg2[%c0_1, %c0_2, %c0_3] : memref<8x16x128xf32, #tpu.memory_space<vmem>>, vector<8x16x128xf32>
    %4 = vector.shape_cast %3 : vector<8x16x128xf32> to vector<128x128xf32>
    %cst_4 = arith.constant dense<0.000000e+00> : vector<8x128xf32>
    %5 = tpu.matmul %2, %4, %cst_4 {dimension_numbers = #tpu.dot_dimension_numbers<[1], [1], [0], [0], [0, 0, 1, 0], [], []>} : vector<8x128xf32>, vector<128x128xf32>, vector<8x128xf32> -> vector<8x128xf32>
    %6 = tpu.iota {dimensions = array<i32: 0>} : vector<8x128xi32>
    %7 = tpu.iota {dimensions = array<i32: 1>} : vector<8x128xi32>
    %c16_i32 = arith.constant 16 : i32
    %8 = vector.broadcast %c16_i32 : i32 to vector<8x128xi32>
    %9 = arith.muli %6, %8 : vector<8x128xi32>
    %10 = arith.cmpi sge, %7, %9 : vector<8x128xi32>
    %c16_i32_5 = arith.constant 16 : i32
    %11 = vector.broadcast %c16_i32_5 : i32 to vector<8x128xi32>
    %12 = arith.addi %9, %11 : vector<8x128xi32>
    %13 = arith.cmpi slt, %7, %12 : vector<8x128xi32>
    %14 = arith.andi %10, %13 : vector<8x128xi1>
    %cst_6 = arith.constant -1.000000e+30 : f32
    %15 = vector.broadcast %cst_6 : f32 to vector<8x128xf32>
    %16 = arith.select %14, %5, %15 : vector<8x128xi1>, vector<8x128xf32>
    %cst_7 = arith.constant dense<0xFF800000> : vector<8xf32>
    %17 = vector.multi_reduction <maximumf>, %16, %cst_7 [1] : vector<8x128xf32> to vector<8xf32>
    %18 = vector.shape_cast %17 : vector<8xf32> to vector<8x1xf32>
    %19 = vector.broadcast %18 : vector<8x1xf32> to vector<8x128xf32>
    %20 = arith.subf %16, %19 : vector<8x128xf32>
    %21 = math.exp %20 : vector<8x128xf32>
    %cst_8 = arith.constant dense<0.000000e+00> : vector<8xf32>
    %22 = vector.multi_reduction <add>, %21, %cst_8 [1] : vector<8x128xf32> to vector<8xf32>
    %23 = vector.shape_cast %22 : vector<8xf32> to vector<8x1xf32>
    %24 = tpu.reciprocal %23 {approx = true} : vector<8x1xf32> -> vector<8x1xf32>
    %25 = arith.mulf %23, %24 : vector<8x1xf32>
    %cst_9 = arith.constant 2.000000e+00 : f32
    %26 = vector.broadcast %cst_9 : f32 to vector<8x1xf32>
    %27 = arith.subf %26, %25 : vector<8x1xf32>
    %28 = arith.mulf %24, %27 : vector<8x1xf32>
    %29 = vector.broadcast %28 : vector<8x1xf32> to vector<8x128xf32>
    %30 = arith.mulf %21, %29 : vector<8x128xf32>
    %c0_10 = arith.constant 0 : index
    %c0_11 = arith.constant 0 : index
    %31 = vector.load %arg4[%c0_10, %c0_11] : memref<8x128xf32, #tpu.memory_space<vmem>>, vector<8x128xf32>
    tpu.vector_store %arg4[%c0_10, %c0_11], %30 {strides = array<i32>} : memref<8x128xf32, #tpu.memory_space<vmem>>, vector<8x128xf32>,
    %c0_12 = arith.constant 0 : index
    %c0_13 = arith.constant 0 : index
    %c0_14 = arith.constant 0 : index
    %32 = vector.load %arg3[%c0_12, %c0_13, %c0_14] : memref<8x16x128xf32, #tpu.memory_space<vmem>>, vector<8x16x128xf32>
    %33 = vector.shape_cast %32 : vector<8x16x128xf32> to vector<128x128xf32>
    %34 = arith.truncf %30 : vector<8x128xf32> to vector<8x128xbf16>
    %35 = arith.truncf %33 : vector<128x128xf32> to vector<128x128xbf16>
    %cst_15 = arith.constant dense<0.000000e+00> : vector<8x128xf32>
    %36 = tpu.matmul %34, %35, %cst_15 {dimension_numbers = #tpu.dot_dimension_numbers<[1], [0], [0], [1], [0, 0, 1, 1], [], []>} : vector<8x128xbf16>, vector<128x128xbf16>, vector<8x128xf32> -> vector<8x128xf32>
    %c0_16 = arith.constant 0 : index
    %c0_17 = arith.constant 0 : index
    %37 = vector.load %arg5[%c0_16, %c0_17] : memref<8x128xf32, #tpu.memory_space<vmem>>, vector<8x128xf32>
    tpu.vector_store %arg5[%c0_16, %c0_17], %36 {strides = array<i32>} : memref<8x128xf32, #tpu.memory_space<vmem>>, vector<8x128xf32>,
    return
  }
  func.func @transform_0(%arg0: i32) -> (i32, i32) {
    %c0_i32 = arith.constant 0 : i32
    %c0_i32_0 = arith.constant 0 : i32
    return %arg0, %c0_i32 : i32, i32
  }
  func.func @transform_1(%arg0: i32) -> (i32, i32, i32) {
    %c0_i32 = arith.constant 0 : i32
    %c0_i32_0 = arith.constant 0 : i32
    %c0_i32_1 = arith.constant 0 : i32
    return %arg0, %c0_i32, %c0_i32_0 : i32, i32, i32
  }
  func.func @transform_2(%arg0: i32) -> (i32, i32, i32) {
    %c0_i32 = arith.constant 0 : i32
    %c0_i32_0 = arith.constant 0 : i32
    %c0_i32_1 = arith.constant 0 : i32
    return %arg0, %c0_i32, %c0_i32_0 : i32, i32, i32
  }
  func.func @transform_3(%arg0: i32) -> (i32, i32) {
    %c0_i32 = arith.constant 0 : i32
    %c0_i32_0 = arith.constant 0 : i32
    return %arg0, %c0_i32 : i32, i32
  }
  func.func @transform_4(%arg0: i32) -> (i32, i32) {
    %c0_i32 = arith.constant 0 : i32
    %c0_i32_0 = arith.constant 0 : i32
    return %arg0, %c0_i32 : i32, i32
  }
}

</mosaic_0001>

<bundles_post_ra>
// kernel: tpu_custom_call.1
= control target key start
LH: loop header
LB: loop body
LE: loop exit
PB: predicated region body
PF: predicated region fallthrough
CT: control target
= control target key end

     0   :  { %s1158_s0 = inlined_call_operand.hbm [shape: f32[16,128], index: 0, kind: input, shape index: {}]   ;;  %s1159_s1 = inlined_call_operand.hbm [shape: f32[16,16,128], index: 1, kind: input, shape index: {}]   ;;  %s1160_s2 = inlined_call_operand.hbm [shape: f32[16,16,128], index: 2, kind: input, shape index: {}]   ;;  %s1161_s3 = inlined_call_operand.hbm [shape: f32[16,128], index: 3, kind: output, shape index: {0}]   ;;  %s1162_s4 = inlined_call_operand.hbm [shape: f32[16,128], index: 4, kind: output, shape index: {1}]  }
   0x1   :  { %1168 = sst [smem:[#allocation18_spill]] %s1159_s1 }
   0x2   :  { %10 = vsyncpa [#allocation3], 0 }
   0x3   :  { %12 = vsyncpa [#allocation3 + $0x1], 0 }
   0x4   :  { %13 = vsyncpa [#allocation6], 0 }
   0x5   :  { %15 = vsyncpa [#allocation6 + $0x1], 0 }
   0x6   :  { %16 = vsyncpa [#allocation4], 0 }
   0x7   :  { %18 = vsyncpa [#allocation4 + $0x1], 0 }
   0x8   :  { %19 = vsyncpa [#allocation10], 0 }
   0x9   :  { %21 = vsyncpa [#allocation10 + $0x1], 0  ;;  %s909_s15 = smov 0   ;;  %s911_s16 = smov 0  }
   0xa   :  { %s913_s17 = smov 0   ;;  %s915_s18 = smov 0  }
   0xb LB: > { %1169 = sst [smem:[#allocation15_spill]] %s876_s17  ;;  %s930_s19 = sadd.s32 4294967295, %s880_s18   ;;  %s880_s18 = sphi %s915_s18, %s1181_s18   ;;  %s876_s17 = sphi %s913_s17, %s1183_s17   ;;  %s872_s16 = sphi %s911_s16, %s1185_s16   ;;  %s868_s15 = sphi %s909_s15, %s1184_s15  }
   0xc   : > { %s592_s20 = sadd.s32 4294967294, %s880_s18   ;;  %s934_s21 = sadd.s32 1, %s880_s18  }
   0xd   : > { %1170 = sst [smem:[#allocation16_spill]] %s934_s21  ;;  %s34_s22 = sadd.s32 1, %s876_s17 }
   0xe   : > { %s31_s23 = ssub.s32 %s880_s18, %s934_s21  ;;  %p41_p0 = scmp.ne.s32.totalorder %s876_s17, %s872_s16 }
   0xf   : > { %p32_p1 = scmp.eq.s32.totalorder %s31_s23, 0  ;;  %p42_p2 = scmp.eq.s32.totalorder %s880_s18, 0 }
  0x10   : > { %p47_p3 = scmp.ne.s32.totalorder %s872_s16, %s868_s15  ;;  %p48_p4 = scmp.eq.s32.totalorder %s930_s19, 0 }
  0x11   : > { %s946_s24 = scalar_select %p32_p1, %s876_s17, %s34_s22  }
  0x12   : > { %p43_p5 = por %p42_p2, %p41_p0  ;;  %p948_p6 = por %p48_p4, %p47_p3 }
  0x13   : > { %1171 = sst [smem:[#allocation17_spill]] %s946_s24  ;;  %p123_p7 = scmp.eq.s32.totalorder %s930_s19, 1 }
  0x14   : > { %p129_p8 = scmp.eq.s32.totalorder %s592_s20, 1  ;;  %p648_p10 = scmp.lt.s32.totalorder %s880_s18, 2 }
  0x15   : > { %p955_p11 = por %p123_p7, %p41_p0  ;;  %s964_s28 = sand.u32 1, %s876_s17  }
  0x16   : > { %p959_p12 = por %p129_p8, %p47_p3  ;;  %p966_p13 = pnand %p648_p10, %p43_p5 }
  0x17   : > { %s194_s30 = sand.u32 1, %s880_s18   ;;  %s597_s5 = sshll.u32 %s964_s28, 7 }
  0x18   : > { %s618_s6 = sshll.u32 %s880_s18, 7  ;;  %s1176_s1 = sld [smem:[#allocation18_spill]] }
  0x19   : > { %s198_s10 = scalar_lea.vmem [#allocation5], %s597_s5  ;;  %s978_s13 = scalar_lea.sflag [#allocation6], %s194_s30 }
  0x1a   : > { %s207_s11 = sshll.u32 %s198_s10, 4  ;;  %p692_p1 = pneg %p966_p13  ;;  %s208_s11 = int_to_ptr.vmem [resolvable:$true] %s207_s11 }
  0x1e   : > { %s204_s9 = scalar_lea.hbm %s1176_s1, %s618_s6  ;;  %s695_s7 = scalar_lea.hbm %s1176_s1, 256 }
  0x1f   : > { %s205_s12 = sshll.u32 %s204_s9, 4  ;;  %s206_s12 = int_to_ptr.hbm [resolvable:$true] %s205_s12 }
  0x20   : > { %s688_s14 = sshra.s32 %s206_s12, 4  ;;  %s689_s14 = int_to_ptr.hbm [resolvable:$true] %s688_s14 }
  0x21   : > { %s690_s20 = scalar_lea.hbm %s689_s14, 128  ;;  %p696_p4 = scmp.lt.s32.totalorder %s689_s14, %s1176_s1 }
  0x22   : > { %p691_p0 = scmp.ne.s32.totalorder %s689_s14, %s690_s20  ;;  %p697_p5 = scmp.lt.s32.totalorder %s695_s7, %s690_s20 }
  0x24   : > { %p693_p2 = pnand %p692_p1, %p691_p0  ;;  %p698_p7 = por %p697_p5, %p696_p4 }
  0x26   : > { %p694_p3 = pneg %p693_p2 }
  0x28   : > { %p699_p8 = pnand %p698_p7, %p694_p3 }
  0x2a   : > { %702 = shalt.err (!%p699_p8)
}
  0x2b   : > { %s1163_s30 = smov 128   ;;  %s1164_s10 = smov 8  }
  0x2c   : > { %637 = dma.hbm_to_vmem [thread:$0]  (!%p966_p13), %s206_s12, 2048, %s208_s11, %s978_s13, %s1163_s30, %s1163_s30, %s1164_s10  }
  0x2d   : > { %s227_s20 = scalar_lea.hbm %s1160_s2, %s618_s6  ;;  %s221_s23 = scalar_lea.vmem [#allocation7], %s597_s5 }
  0x2e   : > { %s230_s7 = sshll.u32 %s221_s23, 4  ;;  %s228_s8 = sshll.u32 %s227_s20, 4  ;;  %s1002_s7 = int_to_ptr.vmem [resolvable:$true] %s230_s7  ;;  %s1004_s8 = int_to_ptr.hbm [resolvable:$true] %s228_s8 }
  0x2f   : > { %p605_p10 = scmp.ge.s32.totalorder %s880_s18, 1  ;;  %p238_p0 = scmp.lt.s32.totalorder %s880_s18, 3 }
  0x30   : > { %s595_s9 = sshll.u32 %s964_s28, 3  ;;  %s596_s1 = sshll.u32 %s880_s18, 3 }
  0x31   : > { %p1010_p2 = pnand %p605_p10, %p238_p0  ;;  %s183_s5 = scalar_lea.hbm %s1158_s0, %s596_s1 }
  0x32   : > { %s179_s22 = scalar_lea.vmem [#allocation2], %s595_s9  ;;  %s185_s20 = sshll.u32 %s183_s5, 4  ;;  %s186_s20 = int_to_ptr.hbm [resolvable:$true] %s185_s20 }
  0x33   : > { %s187_s14 = sshll.u32 %s179_s22, 4  ;;  %s176_s23 = scalar_lea.sflag [#allocation3], %s964_s28  ;;  %s188_s14 = int_to_ptr.vmem [resolvable:$true] %s187_s14 }
  0x34   : > { %s718_s30 = sshra.s32 %s186_s20, 4  ;;  %s725_s21 = scalar_lea.hbm %s1158_s0, 16  ;;  %s719_s30 = int_to_ptr.hbm [resolvable:$true] %s718_s30 }
  0x35   : > { %s720_s10 = scalar_lea.hbm %s719_s30, 8  ;;  %p726_p7 = scmp.lt.s32.totalorder %s719_s30, %s1158_s0 }
  0x36   : > { %p721_p3 = scmp.ne.s32.totalorder %s719_s30, %s720_s10  ;;  %p727_p8 = scmp.lt.s32.totalorder %s725_s21, %s720_s10 }
  0x38   : > { %p723_p4 = pnand %p721_p3, %p692_p1  ;;  %p728_p10 = por %p727_p8, %p726_p7 }
  0x3a   : > { %p724_p5 = pneg %p723_p4 }
  0x3c   : > { %p729_p0 = pnand %p728_p10, %p724_p5 }
  0x3e   : > { %732 = shalt.err (!%p729_p0)
}
  0x3f   : > { %634 = dma.hbm_to_vmem [thread:$0]  (!%p966_p13), %s186_s20, 128, %s188_s14, %s176_s23  }
  0x40   : > { %s748_s28 = sshra.s32 %s1004_s8, 4  ;;  %s755_s21 = scalar_lea.hbm %s1160_s2, 256  ;;  %s749_s28 = int_to_ptr.hbm [resolvable:$true] %s748_s28 }
  0x41   : > { %s750_s9 = scalar_lea.hbm %s749_s28, 128  ;;  %p756_p5 = scmp.lt.s32.totalorder %s749_s28, %s1160_s2 }
  0x42   : > { %p751_p3 = scmp.ne.s32.totalorder %s749_s28, %s750_s9  ;;  %p757_p7 = scmp.lt.s32.totalorder %s755_s21, %s750_s9 }
  0x44   : > { %p753_p4 = pnand %p751_p3, %p692_p1  ;;  %p758_p8 = por %p757_p7, %p756_p5 }
  0x46   : > { %p754_p9 = pneg %p753_p4 }
  0x48   : > { %p759_p10 = pnand %p758_p8, %p754_p9 }
  0x4a   : > { %762 = shalt.err (!%p759_p10)
}
  0x4b   : > { %s1178_s6 = smov 8   ;;  %s1179_s5 = smov 128  }
  0x4c   : > { %640 = dma.hbm_to_vmem [thread:$0]  (!%p966_p13), %s1004_s8, 2048, %s1002_s7, %s978_s13, %s1179_s5, %s1179_s5, %s1178_s6  }
  0x4d   : > { %242 = sbr.rel (%p1010_p2) target bundleno = 671 (0x29f), region = 32  ;;  %s1050_s22 = sand.u32 (!%p1010_p2), 1, %s872_s16  }
  0x4e   : > { %s1053_s14 = sshll.u32 (!%p1010_p2), %s1050_s22, 3  ;;  %s245_s29 = scalar_lea.sflag (!%p1010_p2), [#allocation3], %s1050_s22 }
  0x4f   : > { %s248_s20 = scalar_lea.vmem (!%p1010_p2), [#allocation2], %s1053_s14 }
  0x52   : > { %851 = dma.done.wait (%p948_p6), %s245_s29, 128  }
  0x53   : > { %853 = vsyncadd (%p948_p6), %s245_s29, 4294967168  ;;  %s254_s13 = sand.u32 1, %s930_s19   ;;  %s607_s7 = sshll.u32 %s1050_s22, 7 }
  0x54   : > { %s255_s8 = scalar_lea.sflag [#allocation6], %s254_s13  ;;  %s1065_s11 = scalar_lea.vmem [#allocation5], %s607_s7 }
  0x55   : > { %855 = dma.done.wait (%p948_p6), %s255_s8, 4096  }
  0x56   : > { %857 = vsyncadd (%p948_p6), %s255_s8, 4294963200  ;;  %v328_v0 = vld [vmem:[%s1065_s11 + $0x78] sm:$0xff]  ;;  %v327_v1 = vld [vmem:[%s1065_s11 + $0x70] sm:$0xff]  ;;  %v349_v18 = vlaneseq  ;;  %s1091_s25 = scalar_lea.vmem [#allocation7], %s607_s7  ;;  %s301_s23 = scalar_lea.vmem [#allocation8], %s1053_s14 }
  0x57   : > { %329 = vmatpush.xpose.msra.mxu0 %v328_v0  ;;  %v326_v2 = vld [vmem:[%s1065_s11 + $0x68] sm:$0xff]  ;;  %v325_v3 = vld [vmem:[%s1065_s11 + $0x60] sm:$0xff]  ;;  %v324_v4 = vld [vmem:[%s1065_s11 + $0x58] sm:$0xff]  ;;  %s613_s12 = sshll.u32 %s930_s19, 3  ;;  %s429_s17 = sshll.u32 %s301_s23, 4  ;;  %s430_s17 = int_to_ptr.vmem [resolvable:$true] %s429_s17 }
  0x58   : > { %v323_v5 = vld [vmem:[%s1065_s11 + $0x50] sm:$0xff]  ;;  %v322_v6 = vld [vmem:[%s1065_s11 + $0x48] sm:$0xff]  ;;  %v321_v7 = vld [vmem:[%s1065_s11 + $0x40] sm:$0xff]  ;;  %v350_v19 = vshrl.u32 %v349_v18, 7  ;;  %v352_v21 = vand.u32 127, %v349_v18  ;;  %s427_s9 = scalar_lea.hbm %s1161_s3, %s613_s12  ;;  %s412_s21 = scalar_lea.sflag [#allocation4], %s1050_s22 }
  0x59   : > { %v320_v8 = vld [vmem:[%s1065_s11 + $0x38] sm:$0xff]  ;;  %v319_v9 = vld [vmem:[%s1065_s11 + $0x30] sm:$0xff]  ;;  %v318_v10 = vld [vmem:[%s1065_s11 + $0x28] sm:$0xff]  ;;  %s431_s24 = sshll.u32 %s427_s9, 4  ;;  %s798_s19 = scalar_lea.hbm %s1161_s3, 16  ;;  %s432_s24 = int_to_ptr.hbm [resolvable:$true] %s431_s24 }
  0x5a   : > { %v317_v11 = vld [vmem:[%s1065_s11 + $0x20] sm:$0xff]  ;;  %v316_v12 = vld [vmem:[%s1065_s11 + $0x18] sm:$0xff]  ;;  %v315_v13 = vld [vmem:[%s1065_s11 + $0x10] sm:$0xff]  ;;  %v353_v20 = vmul.u32 16, %v350_v19  ;;  %s792_s30 = sshra.s32 %s432_s24, 4  ;;  %s793_s30 = int_to_ptr.hbm [resolvable:$true] %s792_s30 }
  0x5b   : > { %330 = vmatpush.xpose.msra.mxu0 %v327_v1  ;;  %v314_v14 = vld [vmem:[%s1065_s11 + $0x8] sm:$0xff]  ;;  %v311_v15 = vld [vmem:[%s248_s20] sm:$0xff]  ;;  %v313_v16 = vld [vmem:[%s1065_s11] sm:$0xff]  ;;  %s794_s10 = scalar_lea.hbm %s793_s30, 8  ;;  %p799_p1 = scmp.lt.s32.totalorder %s793_s30, %s1161_s3 }
  0x5c   : > { %v312_v17 = vmul.f32 0.088388346, %v311_v15  ;;  %v355_v22 = vadd.s32 16, %v353_v20  ;;  %vm354_vm0 = vcmp.ge.s32.totalorder %v352_v21, %v353_v20  ;;  %v386_v25 = vld [vmem:[%s1091_s25 + $0x70] sm:$0xff]  ;;  %v387_v26 = vld [vmem:[%s1091_s25 + $0x78] sm:$0xff]  ;;  %v384_v27 = vld [vmem:[%s1091_s25 + $0x60] sm:$0xff]  ;;  %p795_p6 = scmp.ne.s32.totalorder %s793_s30, %s794_s10  ;;  %p800_p2 = scmp.lt.s32.totalorder %s798_s19, %s794_s10 }
  0x5d   : > { %v396_v28 = vpack.c.bf16 %v387_v26, %v386_v25  ;;  %v385_v29 = vld [vmem:[%s1091_s25 + $0x68] sm:$0xff]  ;;  %v382_v31 = vld [vmem:[%s1091_s25 + $0x50] sm:$0xff]  ;;  %v383_v32 = vld [vmem:[%s1091_s25 + $0x58] sm:$0xff] }
  0x5e   : > { %vm356_vm1 = vcmp.lt.s32.totalorder %v352_v21, %v355_v22  ;;  %v395_v30 = vpack.c.bf16 %v385_v29, %v384_v27  ;;  %v394_v33 = vpack.c.bf16 %v383_v32, %v382_v31  ;;  %v380_v34 = vld [vmem:[%s1091_s25 + $0x40] sm:$0xff]  ;;  %v381_v35 = vld [vmem:[%s1091_s25 + $0x48] sm:$0xff]  ;;  %v378_v41 = vld [vmem:[%s1091_s25 + $0x30] sm:$0xff]  ;;  %p796_p9 = pnand %p795_p6, %p955_p11  ;;  %p801_p0 = por %p800_p2, %p799_p1 }
  0x5f   : > { %331 = vmatpush.xpose.msra.mxu0 %v326_v2  ;;  %vm357_vm2 = vmand %vm354_vm0, %vm356_vm1  ;;  %397 = vmatpush.bf16.msra.mxu1 %v396_v28  ;;  %v393_v36 = vpack.c.bf16 %v381_v35, %v380_v34  ;;  %v379_v42 = vld [vmem:[%s1091_s25 + $0x38] sm:$0xff]  ;;  %v376_v44 = vld [vmem:[%s1091_s25 + $0x20] sm:$0xff] }
  0x60   : > { %v392_v43 = vpack.c.bf16 %v379_v42, %v378_v41  ;;  %v377_v45 = vld [vmem:[%s1091_s25 + $0x28] sm:$0xff]  ;;  %v374_v47 = vld [vmem:[%s1091_s25 + $0x10] sm:$0xff]  ;;  %v375_v48 = vld [vmem:[%s1091_s25 + $0x18] sm:$0xff]  ;;  %p797_p13 = pneg %p796_p9 }
  0x61   : > { %v391_v46 = vpack.c.bf16 %v377_v45, %v376_v44  ;;  %v390_v49 = vpack.c.bf16 %v375_v48, %v374_v47  ;;  %v372_v50 = vld [vmem:[%s1091_s25] sm:$0xff]  ;;  %v373_v51 = vld [vmem:[%s1091_s25 + $0x8] sm:$0xff] }
  0x62   : > { %v389_v52 = vpack.c.bf16 %v373_v51, %v372_v50  ;;  %p802_p3 = pnand %p801_p0, %p797_p13 }
  0x63   : > { %332 = vmatpush.xpose.msra.mxu0 %v325_v3  ;;  %398 = vmatpush.bf16.msra.mxu1 %v395_v30 }
  0x67   : > { %333 = vmatpush.xpose.msra.mxu0 %v324_v4  ;;  %399 = vmatpush.bf16.msra.mxu1 %v394_v33 }
  0x6b   : > { %334 = vmatpush.xpose.msra.mxu0 %v323_v5  ;;  %400 = vmatpush.bf16.msra.mxu1 %v393_v36 }
  0x6f   : > { %335 = vmatpush.xpose.msra.mxu0 %v322_v6  ;;  %401 = vmatpush.bf16.msra.mxu1 %v392_v43 }
  0x73   : > { %336 = vmatpush.xpose.msra.mxu0 %v321_v7  ;;  %402 = vmatpush.bf16.msra.mxu1 %v391_v46 }
  0x77   : > { %337 = vmatpush.xpose.msra.mxu0 %v320_v8  ;;  %403 = vmatpush.bf16.msra.mxu1 %v390_v49 }
  0x7b   : > { %338 = vmatpush.xpose.msra.mxu0 %v319_v9  ;;  %404 = vmatpush.bf16.msra.mxu1 %v389_v52 }
  0x7f   : > { %339 = vmatpush.xpose.msra.mxu0 %v318_v10 }
  0x83   : > { %340 = vmatpush.xpose.msra.mxu0 %v317_v11 }
  0x87   : > { %341 = vmatpush.xpose.msra.mxu0 %v316_v12 }
  0x8b   : > { %342 = vmatpush.xpose.msra.mxu0 %v315_v13 }
  0x8f   : > { %343 = vmatpush.xpose.msra.mxu0 %v314_v14 }
  0x93   : > { %344 = vmatpush.xpose.msra.mxu0 %v313_v16 }
  0x96   : > { %345 = vmatmul.f32.vlgmr.msra.gmra.mxu0 %v312_v17 }
 0x113   : > { %v346_v23 = vpop.f32.mrf.mxu0 }
 0x114   : > { %v358_v24 = vsel %vm357_vm2, %v346_v23, -1e+30 }
 0x115   : > { %359 = vmax.xlane.f32.xlu0 %v358_v24 }
 0x188   : > { %v360_v37 = vpop.xlane.xlu0 %359 }
 0x189   : > { %v361_v38 = vsub.f32 %v358_v24, %v360_v37 }
 0x18b   : > { %v362_v39 = vmul.f32 1.442695, %v361_v38 }
 0x18d   : > { %684 = vpow2.f32 %v362_v39 }
 0x193   : > { %v685_v40 = vpop.eup %684 }
 0x194   : > { %364 = vadd.xlane.f32.xlu0 %v685_v40 }
 0x207   : > { %v365_v53 = vpop.xlane.xlu0 %364 }
 0x208   : > { %686 = vrcp.f32 %v365_v53 }
 0x20e   : > { %v687_v54 = vpop.eup %686 }
 0x20f   : > { %v367_v55 = vmul.f32 %v687_v54, %v365_v53 }
 0x211   : > { %v368_v56 = vsub.f32 2.0, %v367_v55 }
 0x213   : > { %v369_v57 = vmul.f32 %v687_v54, %v368_v56 }
 0x215   : > { %v370_v58 = vmul.f32 %v685_v40, %v369_v57 }
 0x217   : > { %v388_v59 = vpack.c.bf16 %v370_v58, %v370_v58  ;;  %371 = vst [vmem:[%s301_s23] sm:$0xff] %v370_v58 }
 0x219   : > { %405 = vmatmul.bf16.vlgmr.msra.gmra.mxu1 %v388_v59 }
 0x21a   : > { %805 = shalt.err (!%p802_p3)
}
 0x21b   : > { %627 = dma.vmem_to_hbm [thread:$0]  (%p955_p11), %s430_s17, 128, %s432_s24, %s412_s21  }
 0x21c   : > { %s441_s8 = scalar_lea.hbm %s1162_s4, %s613_s12  ;;  %s308_s11 = scalar_lea.vmem [#allocation9], %s1053_s14 }
 0x21d   : > { %s443_s25 = sshll.u32 %s308_s11, 4  ;;  %s445_s23 = sshll.u32 %s441_s8, 4  ;;  %s444_s25 = int_to_ptr.vmem [resolvable:$true] %s443_s25  ;;  %s446_s23 = int_to_ptr.hbm [resolvable:$true] %s445_s23 }
 0x21e   : > { %s417_s1 = scalar_lea.sflag [#allocation10], %s1050_s22  ;;  %s820_s28 = sshra.s32 %s446_s23, 4  ;;  %s821_s28 = int_to_ptr.hbm [resolvable:$true] %s820_s28 }
 0x21f   : > { %s822_s9 = scalar_lea.hbm %s821_s28, 8  ;;  %s826_s21 = scalar_lea.hbm %s1162_s4, 16 }
 0x220   : > { %p823_p4 = scmp.ne.s32.totalorder %s821_s28, %s822_s9  ;;  %p827_p8 = scmp.lt.s32.totalorder %s821_s28, %s1162_s4 }
 0x221   : > { %p828_p10 = scmp.lt.s32.totalorder %s826_s21, %s822_s9 }
 0x222   : > { %p824_p5 = pnand %p823_p4, %p955_p11 }
 0x223   : > { %p829_p6 = por %p828_p10, %p827_p8 }
 0x224   : > { %p825_p7 = pneg %p824_p5 }
 0x226   : > { %p830_p9 = pnand %p829_p6, %p825_p7 }
 0x296   : > { %v406_v60 = vpop.f32.mrf.mxu1 }
 0x297   : > { %410 = vst [vmem:[%s308_s11] sm:$0xff] %v406_v60 }
 0x298   : > { %833 = shalt.err (!%p830_p9)
}
 0x299   : > { %628 = dma.vmem_to_hbm [thread:$0]  (%p955_p11), %s444_s25, 128, %s446_s23, %s417_s1  }
 0x29e   : > { %v408_v61 = vpop.f32.mrf.mxu1 }
 0x29f PF: > { %s457_s22 = sand.u32 1, %s868_s15   ;;  %p1180_p13 = scmp.ge.s32.totalorder %s880_s18, 2 }
 0x2a0   : > { %s458_s30 = scalar_lea.sflag [#allocation4], %s457_s22 }
 0x2a1   : > { %p642_p1 = pnand %p1180_p13, %p959_p12 }
 0x2a3   : > { %p643_p2 = pneg %p642_p1 }
 0x2a5   : > { %859 = dma.done.wait (%p643_p2), %s458_s30, 128  }
 0x2a6   : > { %861 = vsyncadd (%p643_p2), %s458_s30, 4294967168  ;;  %s468_s10 = scalar_lea.sflag [#allocation10], %s457_s22 }
 0x2a7   : > { %863 = dma.done.wait (%p643_p2), %s468_s10, 128  }
 0x2a8   : > { %865 = vsyncadd (%p643_p2), %s468_s10, 4294967168  ;;  %s1181_s18 = sld [smem:[#allocation16_spill]]  ;;  %s1184_s15 = smov %s872_s16 }
 0x2a9   : > { %s1182_s26 = sld [smem:[#allocation15_spill]] }
 0x2aa   : > { %s1183_s17 = sld [smem:[#allocation17_spill]] }
 0x2ae   : > { %p24_p11 = scmp.ge.s32.totalorder %s1181_s18, 4  }
 0x2af   : > { %s1185_s16 = smov %s1182_s26 }
 0x2b0   :  { %26 = sbr.rel (!%p24_p11) target bundleno = 11 (0xb), region = 118 }
 0x2b5   :  { %474 = vsyncpa [#allocation3], 1 }
 0x2b6   :  { %476 = vsyncpa [#allocation3 + $0x1], 1 }
 0x2b7   :  { %477 = vsyncpa [#allocation6], 1 }
 0x2b8   :  { %479 = vsyncpa [#allocation6 + $0x1], 1 }
 0x2b9   :  { %480 = vsyncpa [#allocation4], 1 }
 0x2ba   :  { %482 = vsyncpa [#allocation4 + $0x1], 1 }
 0x2bb   :  { %483 = vsyncpa [#allocation10], 1 }
 0x2bc   :  { %485 = vsyncpa [#allocation10 + $0x1], 1 }

</bundles_post_ra>
